<compile_context>
chip_gen: v7x
topology: tpu7x:2x2x1
jax: 0.10.0
libtpu: 0.0.40
codegen_flags: <defaults>
</compile_context>

<pallas_src>
import math

import jax
import jax.numpy as jnp
from jax import lax
from jax.experimental import pallas as pl
from jax.experimental.pallas import tpu as pltpu


def _round_up(x, m):
    return ((x + m - 1) // m) * m


def _feature_crossing_kernel(pairs_ref,     # SMEM (I, 2) int32   (scalar prefetch)
                             emb_ref,       # VMEM (F, TB, D)     field-major tile
                             scores_ref,    # VMEM (TB, I)
                             w_ref,         # VMEM (1, D)
                             b_ref,         # SMEM (1,)  float32
                             out_ref):      # VMEM (TB, 1) float32
    tb, num_i = scores_ref.shape

    scores = scores_ref[...].astype(jnp.float32)                 # (TB, I)
    col_ids = lax.broadcasted_iota(jnp.int32, scores.shape, 1)   # (TB, I)

    def body(i, acc):
        idx1 = pairs_ref[i, 0]
        idx2 = pairs_ref[i, 1]
        e1 = emb_ref[idx1].astype(jnp.float32)                   # (TB, D) leading-dim gather
        e2 = emb_ref[idx2].astype(jnp.float32)                   # (TB, D)
        # Select interaction column i of the scores via a one-hot lane mask
        # (avoids a dynamic lane-dim slice).
        s = jnp.sum(jnp.where(col_ids == i, scores, 0.0),
                    axis=1, keepdims=True)                       # (TB, 1)
        return acc + s * (e1 * e2)

    acc = lax.fori_loop(0, num_i, body,
                        jnp.zeros((tb, emb_ref.shape[2]), jnp.float32),
                        unroll=True)

    # Projection: VPU multiply + lane reduction instead of a (D,1) MXU matmul.
    w = w_ref[...].astype(jnp.float32)                           # (1, D)
    out = jnp.sum(acc * w, axis=1, keepdims=True) + b_ref[0]     # (TB, 1)
    out_ref[...] = out.astype(out_ref.dtype)


def feature_crossing(embeddings, selected_pairs, interaction_scores,
                     weight, bias, *, batch_tile=None):
    """embeddings: (B, F, D); selected_pairs: (I, 2) int; interaction_scores:
    (B, I); weight: (1, D) torch-style; bias: (1,).  Returns (B, 1) float32."""
    B, F, D = embeddings.shape
    I = selected_pairs.shape[0]

    # Clamp pair indices so runtime data can never index out of range.
    pairs = jnp.clip(selected_pairs.astype(jnp.int32), 0, F - 1)
    w = jnp.reshape(weight, (1, D)).astype(jnp.float32)
    bias_arr = jnp.reshape(bias, (1,)).astype(jnp.float32)

    # Field-major layout so the field gather is a leading-axis index in VMEM.
    # (In a real pipeline this layout should be produced upstream to avoid the
    # extra HBM pass; no dtype upcast here — kernel casts on the VPU.)
    emb_fbd = jnp.transpose(embeddings, (1, 0, 2))               # (F, B, D)

    # Batch-tile size: fit the double-buffered (F, TB, D) block in ~24 MiB
    # so it is safe on v7x's 64 MiB VMEM as well as v5e/v6e's 128 MiB.
    if batch_tile is None:
        vmem_budget = 24 * 1024 * 1024
        itemsize = jnp.dtype(emb_fbd.dtype).itemsize
        tb = vmem_budget // max(1, 2 * F * D * itemsize)
        tb = min(1024, tb, _round_up(B, 8))
        batch_tile = max(8, (tb // 8) * 8)
    TB = int(batch_tile)

    B_pad = _round_up(B, TB)
    scores = interaction_scores
    if B_pad != B:
        emb_fbd = jnp.pad(emb_fbd, ((0, 0), (0, B_pad - B), (0, 0)))
        scores = jnp.pad(scores, ((0, B_pad - B), (0, 0)))
    nb = B_pad // TB

    out = pl.pallas_call(
        _feature_crossing_kernel,
        out_shape=jax.ShapeDtypeStruct((B_pad, 1), jnp.float32),
        grid_spec=pltpu.PrefetchScalarGridSpec(
            num_scalar_prefetch=1,
            grid=(nb,),
            in_specs=[
                pl.BlockSpec((F, TB, D), lambda g, p: (0, g, 0)),   # embeddings
                pl.BlockSpec((TB, I), lambda g, p: (g, 0)),         # scores
                pl.BlockSpec((1, D), lambda g, p: (0, 0)),          # weight row
                pl.BlockSpec(memory_space=pltpu.MemorySpace.SMEM),  # bias scalar
            ],
            out_specs=pl.BlockSpec((TB, 1), lambda g, p: (g, 0)),
        ),
        compiler_params=pltpu.CompilerParams(
            dimension_semantics=("parallel",),
            vmem_limit_bytes=40 * 1024 * 1024,
        ),
    )(pairs, emb_fbd, scores, w, bias_arr)

    return out[:B]


def _reference(embeddings, selected_pairs, interaction_scores, weight, bias):
    # Pure-JAX reference mirroring the PyTorch forward.
    crossed = []
    for i in range(selected_pairs.shape[0]):
        idx1, idx2 = int(selected_pairs[i, 0]), int(selected_pairs[i, 1])
        crossed.append(embeddings[:, idx1, :] * embeddings[:, idx2, :])
    crossed = jnp.stack(crossed, axis=1)                       # (B, I, D)
    weighted = crossed * interaction_scores[:, :, None]        # (B, I, D)
    summed = jnp.sum(weighted, axis=1)                         # (B, D)
    return summed @ weight.T + bias                            # (B, 1)


if __name__ == "__main__":
    # Small shapes consistent with the module.
    B, F, D, I = 8, 6, 32, 4

    key = jax.random.PRNGKey(0)
    k_emb, k_sc, k_w = jax.random.split(key, 3)

    embeddings = jax.random.normal(k_emb, (B, F, D), dtype=jnp.float32)
    interaction_scores = jax.random.uniform(k_sc, (B, I), dtype=jnp.float32)
    selected_pairs = jnp.array([[0, 1], [2, 3], [1, 4], [0, 5]], dtype=jnp.int32)

    # nn.Linear(embedding_dim, 1): weight (1, D) xavier-uniform, bias zeros.
    bound = math.sqrt(6.0 / (D + 1))
    weight = jax.random.uniform(k_w, (1, D), minval=-bound, maxval=bound,
                                dtype=jnp.float32)
    bias = jnp.zeros((1,), dtype=jnp.float32)

    out = feature_crossing(embeddings, selected_pairs, interaction_scores,
                           weight, bias)
    out = jax.block_until_ready(out)

    ref = _reference(embeddings, selected_pairs, interaction_scores, weight, bias)
    assert out.shape == (B, 1)
    assert jnp.allclose(out, ref, atol=1e-5, rtol=1e-5), (out, ref)

    print("KERNEL_OK")
</pallas_src>

<mosaic_0001>
module attributes {stable_mosaic.version = 11 : i64} {
  func.func @_feature_crossing_kernel(%arg0: i32, %arg1: memref<4x2xi32, #tpu.memory_space<smem>>, %arg2: memref<6x8x32xf32, #tpu.memory_space<vmem>>, %arg3: memref<8x4xf32, #tpu.memory_space<vmem>>, %arg4: memref<1x32xf32, #tpu.memory_space<vmem>>, %arg5: memref<1xf32, #tpu.memory_space<smem>>, %arg6: memref<8x1xf32, #tpu.memory_space<vmem>>) attributes {dimension_semantics = [#tpu.dimension_semantics<parallel>], iteration_bounds = array<i64: 1>, scalar_prefetch = 1 : i64, scratch_operands = 0 : i64, tpu.core_type = #tpu.core_type<tc>, window_params = [{transform_indices = @transform_0, window_bounds = array<i64: 6, 8, 32>}, {transform_indices = @transform_1, window_bounds = array<i64: 8, 4>}, {pipeline_mode = #tpu.pipeline_mode<synchronous>, transform_indices = @transform_2, window_bounds = array<i64: 1, 32>}, {transform_indices = @transform_3, window_bounds = array<i64: 1>}, {transform_indices = @transform_4, window_bounds = array<i64: 8, 1>}]} {
    %c0 = arith.constant 0 : index
    %c0_0 = arith.constant 0 : index
    %0 = vector.load %arg3[%c0, %c0_0] : memref<8x4xf32, #tpu.memory_space<vmem>>, vector<8x4xf32>
    %1 = tpu.iota {dimensions = array<i32: 1>} : vector<8x4xi32>
    %cst = arith.constant 0.000000e+00 : f32
    %2 = vector.broadcast %cst : f32 to vector<8x32xf32>
    %c0_i32 = arith.constant 0 : i32
    %3 = arith.index_cast %c0_i32 : i32 to index
    %c0_1 = arith.constant 0 : index
    %4 = memref.load %arg1[%3, %c0_1] : memref<4x2xi32, #tpu.memory_space<smem>>
    %5 = arith.index_cast %c0_i32 : i32 to index
    %c1 = arith.constant 1 : index
    %6 = memref.load %arg1[%5, %c1] : memref<4x2xi32, #tpu.memory_space<smem>>
    %7 = arith.index_cast %4 : i32 to index
    %c0_2 = arith.constant 0 : index
    %c0_3 = arith.constant 0 : index
    %8 = vector.load %arg2[%7, %c0_2, %c0_3] : memref<6x8x32xf32, #tpu.memory_space<vmem>>, vector<1x8x32xf32>
    %9 = vector.shape_cast %8 : vector<1x8x32xf32> to vector<8x32xf32>
    %10 = arith.index_cast %6 : i32 to index
    %c0_4 = arith.constant 0 : index
    %c0_5 = arith.constant 0 : index
    %11 = vector.load %arg2[%10, %c0_4, %c0_5] : memref<6x8x32xf32, #tpu.memory_space<vmem>>, vector<1x8x32xf32>
    %12 = vector.shape_cast %11 : vector<1x8x32xf32> to vector<8x32xf32>
    %13 = vector.broadcast %c0_i32 : i32 to vector<8x4xi32>
    %14 = arith.cmpi eq, %1, %13 : vector<8x4xi32>
    %cst_6 = arith.constant 0.000000e+00 : f32
    %15 = vector.broadcast %cst_6 : f32 to vector<8x4xf32>
    %16 = arith.select %14, %0, %15 : vector<8x4xi1>, vector<8x4xf32>
    %cst_7 = arith.constant dense<0.000000e+00> : vector<8xf32>
    %17 = vector.multi_reduction <add>, %16, %cst_7 [1] : vector<8x4xf32> to vector<8xf32>
    %18 = vector.shape_cast %17 : vector<8xf32> to vector<8x1xf32>
    %19 = arith.mulf %9, %12 : vector<8x32xf32>
    %20 = vector.broadcast %18 : vector<8x1xf32> to vector<8x32xf32>
    %21 = arith.mulf %20, %19 : vector<8x32xf32>
    %22 = arith.addf %2, %21 : vector<8x32xf32>
    %c1_i32 = arith.constant 1 : i32
    %23 = arith.index_cast %c1_i32 : i32 to index
    %c0_8 = arith.constant 0 : index
    %24 = memref.load %arg1[%23, %c0_8] : memref<4x2xi32, #tpu.memory_space<smem>>
    %25 = arith.index_cast %c1_i32 : i32 to index
    %c1_9 = arith.constant 1 : index
    %26 = memref.load %arg1[%25, %c1_9] : memref<4x2xi32, #tpu.memory_space<smem>>
    %27 = arith.index_cast %24 : i32 to index
    %c0_10 = arith.constant 0 : index
    %c0_11 = arith.constant 0 : index
    %28 = vector.load %arg2[%27, %c0_10, %c0_11] : memref<6x8x32xf32, #tpu.memory_space<vmem>>, vector<1x8x32xf32>
    %29 = vector.shape_cast %28 : vector<1x8x32xf32> to vector<8x32xf32>
    %30 = arith.index_cast %26 : i32 to index
    %c0_12 = arith.constant 0 : index
    %c0_13 = arith.constant 0 : index
    %31 = vector.load %arg2[%30, %c0_12, %c0_13] : memref<6x8x32xf32, #tpu.memory_space<vmem>>, vector<1x8x32xf32>
    %32 = vector.shape_cast %31 : vector<1x8x32xf32> to vector<8x32xf32>
    %33 = vector.broadcast %c1_i32 : i32 to vector<8x4xi32>
    %34 = arith.cmpi eq, %1, %33 : vector<8x4xi32>
    %cst_14 = arith.constant 0.000000e+00 : f32
    %35 = vector.broadcast %cst_14 : f32 to vector<8x4xf32>
    %36 = arith.select %34, %0, %35 : vector<8x4xi1>, vector<8x4xf32>
    %cst_15 = arith.constant dense<0.000000e+00> : vector<8xf32>
    %37 = vector.multi_reduction <add>, %36, %cst_15 [1] : vector<8x4xf32> to vector<8xf32>
    %38 = vector.shape_cast %37 : vector<8xf32> to vector<8x1xf32>
    %39 = arith.mulf %29, %32 : vector<8x32xf32>
    %40 = vector.broadcast %38 : vector<8x1xf32> to vector<8x32xf32>
    %41 = arith.mulf %40, %39 : vector<8x32xf32>
    %42 = arith.addf %22, %41 : vector<8x32xf32>
    %c2_i32 = arith.constant 2 : i32
    %43 = arith.index_cast %c2_i32 : i32 to index
    %c0_16 = arith.constant 0 : index
    %44 = memref.load %arg1[%43, %c0_16] : memref<4x2xi32, #tpu.memory_space<smem>>
    %45 = arith.index_cast %c2_i32 : i32 to index
    %c1_17 = arith.constant 1 : index
    %46 = memref.load %arg1[%45, %c1_17] : memref<4x2xi32, #tpu.memory_space<smem>>
    %47 = arith.index_cast %44 : i32 to index
    %c0_18 = arith.constant 0 : index
    %c0_19 = arith.constant 0 : index
    %48 = vector.load %arg2[%47, %c0_18, %c0_19] : memref<6x8x32xf32, #tpu.memory_space<vmem>>, vector<1x8x32xf32>
    %49 = vector.shape_cast %48 : vector<1x8x32xf32> to vector<8x32xf32>
    %50 = arith.index_cast %46 : i32 to index
    %c0_20 = arith.constant 0 : index
    %c0_21 = arith.constant 0 : index
    %51 = vector.load %arg2[%50, %c0_20, %c0_21] : memref<6x8x32xf32, #tpu.memory_space<vmem>>, vector<1x8x32xf32>
    %52 = vector.shape_cast %51 : vector<1x8x32xf32> to vector<8x32xf32>
    %53 = vector.broadcast %c2_i32 : i32 to vector<8x4xi32>
    %54 = arith.cmpi eq, %1, %53 : vector<8x4xi32>
    %cst_22 = arith.constant 0.000000e+00 : f32
    %55 = vector.broadcast %cst_22 : f32 to vector<8x4xf32>
    %56 = arith.select %54, %0, %55 : vector<8x4xi1>, vector<8x4xf32>
    %cst_23 = arith.constant dense<0.000000e+00> : vector<8xf32>
    %57 = vector.multi_reduction <add>, %56, %cst_23 [1] : vector<8x4xf32> to vector<8xf32>
    %58 = vector.shape_cast %57 : vector<8xf32> to vector<8x1xf32>
    %59 = arith.mulf %49, %52 : vector<8x32xf32>
    %60 = vector.broadcast %58 : vector<8x1xf32> to vector<8x32xf32>
    %61 = arith.mulf %60, %59 : vector<8x32xf32>
    %62 = arith.addf %42, %61 : vector<8x32xf32>
    %c3_i32 = arith.constant 3 : i32
    %63 = arith.index_cast %c3_i32 : i32 to index
    %c0_24 = arith.constant 0 : index
    %64 = memref.load %arg1[%63, %c0_24] : memref<4x2xi32, #tpu.memory_space<smem>>
    %65 = arith.index_cast %c3_i32 : i32 to index
    %c1_25 = arith.constant 1 : index
    %66 = memref.load %arg1[%65, %c1_25] : memref<4x2xi32, #tpu.memory_space<smem>>
    %67 = arith.index_cast %64 : i32 to index
    %c0_26 = arith.constant 0 : index
    %c0_27 = arith.constant 0 : index
    %68 = vector.load %arg2[%67, %c0_26, %c0_27] : memref<6x8x32xf32, #tpu.memory_space<vmem>>, vector<1x8x32xf32>
    %69 = vector.shape_cast %68 : vector<1x8x32xf32> to vector<8x32xf32>
    %70 = arith.index_cast %66 : i32 to index
    %c0_28 = arith.constant 0 : index
    %c0_29 = arith.constant 0 : index
    %71 = vector.load %arg2[%70, %c0_28, %c0_29] : memref<6x8x32xf32, #tpu.memory_space<vmem>>, vector<1x8x32xf32>
    %72 = vector.shape_cast %71 : vector<1x8x32xf32> to vector<8x32xf32>
    %73 = vector.broadcast %c3_i32 : i32 to vector<8x4xi32>
    %74 = arith.cmpi eq, %1, %73 : vector<8x4xi32>
    %cst_30 = arith.constant 0.000000e+00 : f32
    %75 = vector.broadcast %cst_30 : f32 to vector<8x4xf32>
    %76 = arith.select %74, %0, %75 : vector<8x4xi1>, vector<8x4xf32>
    %cst_31 = arith.constant dense<0.000000e+00> : vector<8xf32>
    %77 = vector.multi_reduction <add>, %76, %cst_31 [1] : vector<8x4xf32> to vector<8xf32>
    %78 = vector.shape_cast %77 : vector<8xf32> to vector<8x1xf32>
    %79 = arith.mulf %69, %72 : vector<8x32xf32>
    %80 = vector.broadcast %78 : vector<8x1xf32> to vector<8x32xf32>
    %81 = arith.mulf %80, %79 : vector<8x32xf32>
    %82 = arith.addf %62, %81 : vector<8x32xf32>
    %c4_i32 = arith.constant 4 : i32
    %c0_32 = arith.constant 0 : index
    %c0_33 = arith.constant 0 : index
    %83 = vector.load %arg4[%c0_32, %c0_33] : memref<1x32xf32, #tpu.memory_space<vmem>>, vector<1x32xf32>
    %84 = vector.broadcast %83 : vector<1x32xf32> to vector<8x32xf32>
    %85 = arith.mulf %82, %84 : vector<8x32xf32>
    %cst_34 = arith.constant dense<0.000000e+00> : vector<8xf32>
    %86 = vector.multi_reduction <add>, %85, %cst_34 [1] : vector<8x32xf32> to vector<8xf32>
    %87 = vector.shape_cast %86 : vector<8xf32> to vector<8x1xf32>
    %c0_35 = arith.constant 0 : index
    %88 = memref.load %arg5[%c0_35] : memref<1xf32, #tpu.memory_space<smem>>
    %89 = vector.broadcast %88 : f32 to vector<8x1xf32>
    %90 = arith.addf %87, %89 : vector<8x1xf32>
    %c0_36 = arith.constant 0 : index
    %c0_37 = arith.constant 0 : index
    %91 = vector.load %arg6[%c0_36, %c0_37] : memref<8x1xf32, #tpu.memory_space<vmem>>, vector<8x1xf32>
    tpu.vector_store %arg6[%c0_36, %c0_37], %90 {strides = array<i32>} : memref<8x1xf32, #tpu.memory_space<vmem>>, vector<8x1xf32>,
    return
  }
  func.func @transform_0(%arg0: i32, %arg1: memref<4x2xi32, #tpu.memory_space<smem>>) -> (i32, i32, i32) {
    %c0_i32 = arith.constant 0 : i32
    %c0_i32_0 = arith.constant 0 : i32
    %c0_i32_1 = arith.constant 0 : i32
    return %c0_i32, %arg0, %c0_i32_0 : i32, i32, i32
  }
  func.func @transform_1(%arg0: i32, %arg1: memref<4x2xi32, #tpu.memory_space<smem>>) -> (i32, i32) {
    %c0_i32 = arith.constant 0 : i32
    %c0_i32_0 = arith.constant 0 : i32
    return %arg0, %c0_i32 : i32, i32
  }
  func.func @transform_2(%arg0: i32, %arg1: memref<4x2xi32, #tpu.memory_space<smem>>) -> (i32, i32) {
    %c0_i32 = arith.constant 0 : i32
    %c0_i32_0 = arith.constant 0 : i32
    %c0_i32_1 = arith.constant 0 : i32
    return %c0_i32, %c0_i32_0 : i32, i32
  }
  func.func @transform_3(%arg0: i32, %arg1: memref<4x2xi32, #tpu.memory_space<smem>>) -> i32 {
    %c0_i32 = arith.constant 0 : i32
    %c0_i32_0 = arith.constant 0 : i32
    return %c0_i32 : i32
  }
  func.func @transform_4(%arg0: i32, %arg1: memref<4x2xi32, #tpu.memory_space<smem>>) -> (i32, i32) {
    %c0_i32 = arith.constant 0 : i32
    %c0_i32_0 = arith.constant 0 : i32
    return %arg0, %c0_i32 : i32, i32
  }
}

</mosaic_0001>

<bundles_post_ra>
// kernel: tpu_custom_call.1
= control target key start
LH: loop header
LB: loop body
LE: loop exit
PB: predicated region body
PF: predicated region fallthrough
CT: control target
= control target key end

     0   :  { %s264_s0 = inlined_call_operand.vmem [shape: s32[4,2], index: 0, kind: input, shape index: {}]   ;;  %s265_s1 = inlined_call_operand.hbm [shape: f32[6,8,32], index: 1, kind: input, shape index: {}]   ;;  %s266_s2 = inlined_call_operand.vmem [shape: f32[8,4], index: 2, kind: input, shape index: {}]   ;;  %s267_s3 = inlined_call_operand.vmem [shape: f32[1,32], index: 3, kind: input, shape index: {}]   ;;  %s268_s4 = inlined_call_operand.<no memory space> [shape: f32[1], index: 4, kind: input, shape index: {}]   ;;  %s269_s5 = inlined_call_operand.vmem [shape: f32[8,1], index: 5, kind: output, shape index: {}]  }
   0x1   :  { %s10_s20 = sshll.u32 %s264_s0, 4  ;;  %s11_s20 = int_to_ptr.vmem [resolvable:$true] %s10_s20 }
   0x2   :  { %s165_s21 = scalar_lea.vmem %s11_s20, 64  ;;  %p170_p1 = scmp.lt.s32.totalorder %s11_s20, %s11_s20 }
   0x3   :  { %p166_p0 = scmp.ne.s32.totalorder %s11_s20, %s165_s21  ;;  %p171_p2 = scmp.lt.s32.totalorder %s165_s21, %s165_s21 }
   0x5   :  { %p172_p3 = por %p171_p2, %p170_p1 }
   0x7   :  { %p173_p4 = pnand %p172_p3, %p166_p0 }
   0x9   :  { %176 = shalt.err (!%p173_p4)  }
   0xa   :  { %s203_s22 = smov [#allocation3]  }
   0xb   :  { %13 = dma.vmem_to_smem %s11_s20, 64, %s203_s22, [#allocation2] }
   0xc   :  { %199 = dma.done.wait [#allocation2], 64 }
   0xd   :  { %200 = vsyncadd [#allocation2], 4294967232 }
   0xe   :  { %16 = sfence }
   0xf   :  { %17 = vsyncpa [#allocation6], 0  ;;  %s204_s23 = smov [#allocation5]   ;;  %s177_s0 = scalar_lea.hbm %s265_s1, 768 }
  0x10   :  { %s23_s24 = sshll.u32 %s204_s23, 4  ;;  %p178_p5 = scmp.ne.s32.totalorder %s265_s1, %s177_s0  ;;  %s24_s24 = int_to_ptr.vmem [resolvable:$true] %s23_s24 }
  0x11   :  { %p181_p6 = scmp.lt.u32.totalorder %s177_s0, %s265_s1 }
  0x13   :  { %p183_p7 = pnand %p181_p6, %p178_p5 }
  0x15   :  { %186 = shalt.err (!%p183_p7)
}
  0x16   :  { %s187_s6 = scalar_lea.vmem %s24_s24, 768  ;;  %p192_p9 = scmp.lt.s32.totalorder %s24_s24, %s24_s24 }
  0x17   :  { %p188_p8 = scmp.ne.s32.totalorder %s24_s24, %s187_s6  ;;  %p193_p10 = scmp.lt.s32.totalorder %s187_s6, %s187_s6 }
  0x19   :  { %p194_p11 = por %p193_p10, %p192_p9 }
  0x1b   :  { %p195_p12 = pnand %p194_p11, %p188_p8 }
  0x1d   :  { %198 = shalt.err (!%p195_p12)
}
  0x1e   :  { %s205_s7 = smov 128   ;;  %s206_s8 = smov 8  }
  0x1f   :  { %29 = dma.hbm_to_vmem [thread:$0]  %s265_s1, 768, %s24_s24, [#allocation6], %s205_s7, %s205_s7, %s206_s8  }
  0x20   :  { %201 = dma.done.wait [#allocation6], 768  }
  0x21   :  { %202 = vsyncadd [#allocation6], 4294966528  ;;  %v40_v0 = vlaneseq  ;;  %vm52_vm4 = vcmask 31744   ;;  %v39_v2 = vld [vmem:[%s266_s2] sm:$0xff]  ;;  %s42_s1 = sld [smem:[#allocation3]]  ;;  %s145_s13 = sld [smem:[#allocation3 + $0x1]]  ;;  %v120_v37 = vstv %s268_s4 }
  0x22   :  { %s148_s14 = sld [smem:[#allocation3 + $0x80]]  ;;  %s149_s15 = sld [smem:[#allocation3 + $0x81]]  ;;  %v160_v33 = vld [vmem:[%s267_s3] ss:$0 sm:$0xff]  ;;  %vm115_vm5 = vcmask 261120   ;;  %vm122_vm6 = vcmask 7168  }
  0x23   :  { %v41_v1 = vand.u32 127, %v40_v0  ;;  %s152_s16 = sld [smem:[#allocation3 + $0x100]]  ;;  %s153_s17 = sld [smem:[#allocation3 + $0x101]] }
  0x24   :  { %s156_s18 = sld [smem:[#allocation3 + $0x180]]  ;;  %s157_s2 = sld [smem:[#allocation3 + $0x181]] }
  0x25   :  { %vm50_vm0 = vcmp.eq.s32.totalorder %v41_v1, 0  ;;  %vm83_vm1 = vcmp.eq.s32.totalorder %v41_v1, 2  ;;  %vm67_vm2 = vcmp.eq.s32.totalorder %v41_v1, 1  ;;  %vm99_vm3 = vcmp.eq.s32.totalorder %v41_v1, 3 }
  0x26   :  { %v51_v3 = vsel %vm50_vm0, %v39_v2, 0.0  ;;  %v84_v4 = vsel %vm83_vm1, %v39_v2, 0.0  ;;  %v68_v5 = vsel %vm67_vm2, %v39_v2, 0.0  ;;  %v100_v6 = vsel %vm99_vm3, %v39_v2, 0.0 }
  0x27   :  { %v53_v7 = vsel %vm52_vm4, %v51_v3, 0.0  ;;  %v85_v8 = vsel %vm52_vm4, %v84_v4, 0.0  ;;  %v69_v9 = vsel %vm52_vm4, %v68_v5, 0.0  ;;  %v101_v10 = vsel %vm52_vm4, %v100_v6, 0.0  ;;  %s146_s19 = sshll.u32 %s42_s1, 3  ;;  %s147_s20 = sshll.u32 %s145_s13, 3 }
  0x28   :  { %54 = vadd.xlane.f32.xlu0 %v53_v7  ;;  %86 = vadd.xlane.f32.xlu1 %v85_v8  ;;  %s150_s21 = sshll.u32 %s148_s14, 3  ;;  %s151_s22 = sshll.u32 %s149_s15, 3 }
  0x29   :  { %s154_s23 = sshll.u32 %s152_s16, 3  ;;  %s155_s24 = sshll.u32 %s153_s17, 3 }
  0x2a   :  { %s158_s25 = sshll.u32 %s156_s18, 3  ;;  %s159_s26 = sshll.u32 %s157_s2, 3 }
  0x2b   :  { %s45_s0 = scalar_lea.vmem [#allocation5], %s146_s19  ;;  %s48_s27 = scalar_lea.vmem [#allocation5], %s147_s20 }
  0x2c   :  { %70 = vadd.xlane.f32.xlu0 %v69_v9  ;;  %102 = vadd.xlane.f32.xlu1 %v101_v10  ;;  %v46_v11 = vld [vmem:[%s45_s0] sm:$0xff]  ;;  %s62_s28 = scalar_lea.vmem [#allocation5], %s150_s21  ;;  %s65_s29 = scalar_lea.vmem [#allocation5], %s151_s22 }
  0x2d   :  { %v49_v12 = vld [vmem:[%s48_s27] sm:$0xff]  ;;  %s78_s30 = scalar_lea.vmem [#allocation5], %s154_s23  ;;  %s81_s6 = scalar_lea.vmem [#allocation5], %s155_s24 }
  0x2e   :  { %v63_v13 = vld [vmem:[%s62_s28] sm:$0xff]  ;;  %s94_s7 = scalar_lea.vmem [#allocation5], %s158_s25  ;;  %s97_s8 = scalar_lea.vmem [#allocation5], %s159_s26  ;;  %v56_v21 = vmul.f32 %v49_v12, %v46_v11 }
  0x2f   :  { %v66_v14 = vld [vmem:[%s65_s29] sm:$0xff] }
  0x30   :  { %v79_v15 = vld [vmem:[%s78_s30] sm:$0xff]  ;;  %v72_v22 = vmul.f32 %v66_v14, %v63_v13 }
  0x31   :  { %v82_v17 = vld [vmem:[%s81_s6] sm:$0xff] }
  0x32   :  { %v95_v19 = vld [vmem:[%s94_s7] sm:$0xff]  ;;  %v88_v23 = vmul.f32 %v82_v17, %v79_v15 }
  0x33   :  { %v98_v20 = vld [vmem:[%s97_s8] sm:$0xff] }
  0x34   :  { %v104_v24 = vmul.f32 %v98_v20, %v95_v19 }
  0xb5   :  { %v55_v16 = vpop.xlane.xlu0 %54  ;;  %v87_v18 = vpop.xlane.xlu1 %86 }
  0xb6   :  { %v57_v27 = vmul.f32 %v56_v21, %v55_v16  ;;  %v89_v29 = vmul.f32 %v88_v23, %v87_v18 }
  0xb9   :  { %v71_v25 = vpop.xlane.xlu0 %70  ;;  %v103_v26 = vpop.xlane.xlu1 %102 }
  0xba   :  { %v73_v28 = vmul.f32 %v72_v22, %v71_v25  ;;  %v105_v31 = vmul.f32 %v104_v24, %v103_v26 }
  0xbc   :  { %v74_v30 = vadd.f32 %v73_v28, %v57_v27 }
  0xbe   :  { %v90_v32 = vadd.f32 %v89_v29, %v74_v30 }
  0xc0   :  { %v106_v34 = vadd.f32 %v105_v31, %v90_v32 }
  0xc2   :  { %v114_v35 = vmul.f32 %v160_v33, %v106_v34 }
  0xc4   :  { %v116_v36 = vsel %vm115_vm5, %v114_v35, 0.0 }
  0xc5   :  { %117 = vadd.xlane.f32.xlu0 %v116_v36 }
 0x152   :  { %v118_v38 = vpop.xlane.xlu0 %117 }
 0x153   :  { %v121_v39 = vadd.f32 %v120_v37, %v118_v38 }
 0x155   :  { %123 = vst.msk [vmem:[%s269_s5] sm:$0xff] %vm122_vm6, %v121_v39 }
 0x156   :  { %128 = vsyncpa [#allocation6], 1 }

</bundles_post_ra>
